<compile_context>
chip_gen: v5e
topology: v5e:2x2
jax: 0.10.0
libtpu: 0.0.40
codegen_flags: <defaults>
</compile_context>

<pallas_src>
import math

import jax
import jax.numpy as jnp
from jax.experimental import pallas as pl
from jax.experimental.pallas import tpu as pltpu


def _pos_encoding_kernel(x_ref, pe_ref, o_ref):
    # x_ref: (block_s, B, D)   pe_ref: (B, D)   o_ref: (block_s, B, D)
    # Broadcast pe over the leading (seq) axis; pure VPU add, lane-dense store.
    o_ref[...] = x_ref[...] + pe_ref[...][None, :, :]


def make_positional_encoding_buffer(d_model: int, max_len: int = 200,
                                    dtype=jnp.float32):
    """Matches the torch buffer built in PositionalEncoding.__init__."""
    position = jnp.arange(max_len, dtype=jnp.float32)[:, None]           # (max_len, 1)
    div_term = jnp.exp(jnp.arange(0, d_model, 2, dtype=jnp.float32)
                       * (-math.log(10000.0) / d_model))                 # (d_model/2,)
    pe = jnp.zeros((max_len, 1, d_model), dtype=jnp.float32)
    pe = pe.at[:, 0, 0::2].set(jnp.sin(position * div_term))
    pe = pe.at[:, 0, 1::2].set(jnp.cos(position * div_term))
    return pe.astype(dtype)


def _pick_block_s(S: int, B: int, D: int, itemsize: int,
                  vmem_budget_bytes: int = 8 << 20) -> int:
    """Largest divisor of S whose (block_s, B, D) tile (x + out, double-
    buffered => ~4 tiles live) fits a conservative VMEM budget."""
    per_row_bytes = B * D * itemsize
    max_rows = max(1, vmem_budget_bytes // (4 * per_row_bytes))
    best = 1
    for cand in range(1, S + 1):
        if S % cand == 0 and cand <= max_rows:
            best = cand
    return best


def positional_encoding(x, pe, *, block_s: int | None = None):
    """x: (seq_len, batch, d_model); pe: (max_len, 1, d_model) buffer."""
    S, B, D = x.shape
    # pe.permute(1,0,2)[:, :batch, :]  ->  (B, D) tile added to every seq row.
    pe_slice = pe[:B, 0, :].astype(x.dtype)

    if block_s is None:
        block_s = _pick_block_s(S, B, D, x.dtype.itemsize)
    if S % block_s != 0:
        block_s = S
    grid = (S // block_s,)

    out = pl.pallas_call(
        _pos_encoding_kernel,
        out_shape=jax.ShapeDtypeStruct((S, B, D), x.dtype),
        grid=grid,
        in_specs=[
            pl.BlockSpec((block_s, B, D), lambda i: (i, 0, 0)),
            pl.BlockSpec((B, D), lambda i: (0, 0)),   # resident across seq blocks
        ],
        out_specs=pl.BlockSpec((block_s, B, D), lambda i: (i, 0, 0)),
        compiler_params=pltpu.CompilerParams(
            dimension_semantics=("parallel",)),
    )(x, pe_slice)

    # TODO(synk): training-mode nn.Dropout (p=0.1) is not implemented; output
    # matches the module in eval/inference mode (dropout == identity).
    return out


if __name__ == "__main__":
    key = jax.random.PRNGKey(0)

    seq_len, batch, d_model, max_len = 8, 2, 128, 200

    x = jax.random.normal(key, (seq_len, batch, d_model), dtype=jnp.float32)
    pe = make_positional_encoding_buffer(d_model, max_len)

    out = positional_encoding(x, pe)
    jax.block_until_ready(out)

    # Plain-JAX reference mirroring the exact PyTorch forward.
    pe_perm = jnp.transpose(pe, (1, 0, 2))           # (1, max_len, d_model)
    ref = x + pe_perm[:, :x.shape[1], :]             # slice by batch, broadcast over seq

    assert out.shape == (seq_len, batch, d_model)
    assert jnp.allclose(out, ref, atol=1e-6), "mismatch vs reference"

    print("KERNEL_OK")
</pallas_src>

<mosaic_0001>
module attributes {stable_mosaic.version = 11 : i64} {
  func.func @_pos_encoding_kernel(%arg0: i32, %arg1: memref<8x2x128xf32, #tpu.memory_space<vmem>>, %arg2: memref<2x128xf32, #tpu.memory_space<vmem>>, %arg3: memref<8x2x128xf32, #tpu.memory_space<vmem>>) attributes {dimension_semantics = [#tpu.dimension_semantics<parallel>], iteration_bounds = array<i64: 1>, scalar_prefetch = 0 : i64, scratch_operands = 0 : i64, tpu.core_type = #tpu.core_type<tc>, window_params = [{transform_indices = @transform_0, window_bounds = array<i64: 8, 2, 128>}, {pipeline_mode = #tpu.pipeline_mode<synchronous>, transform_indices = @transform_1, window_bounds = array<i64: 2, 128>}, {transform_indices = @transform_2, window_bounds = array<i64: 8, 2, 128>}]} {
    %c0 = arith.constant 0 : index
    %c0_0 = arith.constant 0 : index
    %c0_1 = arith.constant 0 : index
    %0 = vector.load %arg1[%c0, %c0_0, %c0_1] : memref<8x2x128xf32, #tpu.memory_space<vmem>>, vector<8x2x128xf32>
    %c0_2 = arith.constant 0 : index
    %c0_3 = arith.constant 0 : index
    %1 = vector.load %arg2[%c0_2, %c0_3] : memref<2x128xf32, #tpu.memory_space<vmem>>, vector<2x128xf32>
    %2 = vector.shape_cast %1 : vector<2x128xf32> to vector<1x2x128xf32>
    %3 = vector.broadcast %2 : vector<1x2x128xf32> to vector<8x2x128xf32>
    %4 = arith.addf %0, %3 : vector<8x2x128xf32>
    %c0_4 = arith.constant 0 : index
    %c0_5 = arith.constant 0 : index
    %c0_6 = arith.constant 0 : index
    %5 = vector.load %arg3[%c0_4, %c0_5, %c0_6] : memref<8x2x128xf32, #tpu.memory_space<vmem>>, vector<8x2x128xf32>
    tpu.vector_store %arg3[%c0_4, %c0_5, %c0_6], %4 {strides = array<i32>} : memref<8x2x128xf32, #tpu.memory_space<vmem>>, vector<8x2x128xf32>,
    return
  }
  func.func @transform_0(%arg0: i32) -> (i32, i32, i32) {
    %c0_i32 = arith.constant 0 : i32
    %c0_i32_0 = arith.constant 0 : i32
    %c0_i32_1 = arith.constant 0 : i32
    return %arg0, %c0_i32, %c0_i32_0 : i32, i32, i32
  }
  func.func @transform_1(%arg0: i32) -> (i32, i32) {
    %c0_i32 = arith.constant 0 : i32
    %c0_i32_0 = arith.constant 0 : i32
    %c0_i32_1 = arith.constant 0 : i32
    return %c0_i32, %c0_i32_0 : i32, i32
  }
  func.func @transform_2(%arg0: i32) -> (i32, i32, i32) {
    %c0_i32 = arith.constant 0 : i32
    %c0_i32_0 = arith.constant 0 : i32
    %c0_i32_1 = arith.constant 0 : i32
    return %arg0, %c0_i32, %c0_i32_0 : i32, i32, i32
  }
}

</mosaic_0001>

<bundles_post_ra>
// kernel: tpu_custom_call.1
= control target key start
LH: loop header
LB: loop body
LE: loop exit
PB: predicated region body
PF: predicated region fallthrough
CT: control target
= control target key end

     0   :  { %7 = vsyncpa [#allocation3], 0  ;;  %s205_s0 = inlined_call_operand.hbm [shape: f32[8,2,128], index: 0, kind: input, shape index: {}]   ;;  %s206_s1 = inlined_call_operand.hbm [shape: f32[2,128], index: 1, kind: input, shape index: {}]   ;;  %s207_s2 = inlined_call_operand.hbm [shape: f32[8,2,128], index: 2, kind: output, shape index: {}]  }
   0x1   :  { %8 = vsyncpa [#allocation6], 0 }
   0x2   :  { %9 = vsyncpa [#allocation4], 0  ;;  %s14_s11 = sshll.u32 %s205_s0, 4  ;;  %s170_s12 = smov [#allocation2]   ;;  %s15_s11 = int_to_ptr.hbm [resolvable:$true] %s14_s11 }
   0x3   :  { %s16_s13 = sshll.u32 %s170_s12, 4  ;;  %s28_s16 = sshll.u32 %s206_s1, 4  ;;  %s17_s13 = int_to_ptr.vmem [resolvable:$true] %s16_s13  ;;  %s29_s16 = int_to_ptr.hbm [resolvable:$true] %s28_s16 }
   0x4   :  { %s171_s17 = smov 32   ;;  %s172_s18 = smov 2  }
   0x5   :  { %22 = dma.hbm_to_vmem [thread:$0]  %s15_s11, 256, %s17_s13, [#allocation3], %s171_s17, %s171_s17, %s172_s18  }
   0x6   :  { %s173_s19 = smov [#allocation5]  }
   0x7   :  { %s30_s20 = sshll.u32 %s173_s19, 4  ;;  %s31_s20 = int_to_ptr.vmem [resolvable:$true] %s30_s20 }
   0x8   :  { %33 = dma.hbm_to_vmem [thread:$0]  %s29_s16, 32, %s31_s20, [#allocation6]  }
   0x9   :  { %164 = dma.done.wait [#allocation3], 256  }
   0xa   :  { %165 = vsyncadd [#allocation3], 4294967040 }
   0xb   :  { %166 = dma.done.wait [#allocation6], 32  }
   0xc   :  { %167 = vsyncadd [#allocation6], 4294967264  ;;  %v42_v0 = vld [vmem:[#allocation2] sm:$0x3]  ;;  %v50_v1 = vld [vmem:[#allocation5] sm:$0x3] }
   0xd   :  { %v43_v2 = vld [vmem:[#allocation2 + $0x2] sm:$0x3]  ;;  %v51_v3 = vadd.f32 %v50_v1, %v42_v0  ;;  %v44_v5 = vld [vmem:[#allocation2 + $0x4] sm:$0x3]  ;;  %v45_v6 = vld [vmem:[#allocation2 + $0x6] sm:$0x3] }
   0xe   :  { %v52_v4 = vadd.f32 %v50_v1, %v43_v2  ;;  %v46_v7 = vld [vmem:[#allocation2 + $0x8] sm:$0x3]  ;;  %v53_v8 = vadd.f32 %v50_v1, %v44_v5  ;;  %v54_v9 = vadd.f32 %v50_v1, %v45_v6  ;;  %v47_v10 = vld [vmem:[#allocation2 + $0xa] sm:$0x3]  ;;  %v48_v11 = vld [vmem:[#allocation2 + $0xc] sm:$0x3] }
   0xf   :  { %59 = vst [vmem:[#allocation7] sm:$0x3] %v51_v3  ;;  %v55_v12 = vadd.f32 %v50_v1, %v46_v7  ;;  %v49_v13 = vld [vmem:[#allocation2 + $0xe] sm:$0x3]  ;;  %v56_v14 = vadd.f32 %v50_v1, %v47_v10  ;;  %v57_v15 = vadd.f32 %v50_v1, %v48_v11  ;;  %s174_s0 = smov [#allocation7]   ;;  %s73_s23 = sshll.u32 %s207_s2, 4  ;;  %s74_s23 = int_to_ptr.hbm [resolvable:$true] %s73_s23 }
  0x10   :  { %60 = vst [vmem:[#allocation7 + $0x2] sm:$0x3] %v52_v4  ;;  %s71_s1 = sshll.u32 %s174_s0, 4  ;;  %v58_v16 = vadd.f32 %v50_v1, %v49_v13  ;;  %s72_s1 = int_to_ptr.vmem [resolvable:$true] %s71_s1 }
  0x11   :  { %61 = vst [vmem:[#allocation7 + $0x4] sm:$0x3] %v53_v8 }
  0x12   :  { %62 = vst [vmem:[#allocation7 + $0x6] sm:$0x3] %v54_v9 }
  0x13   :  { %63 = vst [vmem:[#allocation7 + $0x8] sm:$0x3] %v55_v12 }
  0x14   :  { %64 = vst [vmem:[#allocation7 + $0xa] sm:$0x3] %v56_v14 }
  0x15   :  { %65 = vst [vmem:[#allocation7 + $0xc] sm:$0x3] %v57_v15 }
  0x16   :  { %66 = vst [vmem:[#allocation7 + $0xe] sm:$0x3] %v58_v16 }
  0x17   :  { %79 = dma.vmem_to_hbm [thread:$0]  %s72_s1, 256, %s74_s23, [#allocation4], %s171_s17, %s171_s17, %s172_s18  }
  0x18   :  { %168 = dma.done.wait [#allocation4], 256  }
  0x19   :  { %169 = vsyncadd [#allocation4], 4294967040 }
  0x1a   :  { %84 = vsyncpa [#allocation3], 1 }
  0x1b   :  { %85 = vsyncpa [#allocation6], 1 }
  0x1c   :  { %86 = vsyncpa [#allocation4], 1 }

</bundles_post_ra>
